<compile_context>
chip_gen: v7x
topology: tpu7x:2x2x1
jax: 0.10.0
libtpu: 0.0.40
codegen_flags: <defaults>
</compile_context>

<pallas_src>
import jax
import jax.numpy as jnp
from jax.experimental import pallas as pl
from jax.experimental.pallas import tpu as pltpu

LANES = 128


def mlp_kernel(x_ref, w1f_ref, b1f_ref, w2f_ref, b2f_ref, o_ref):
    """One batch tile.

    x_ref  : (4, S, 128) VMEM f32 — feature-major; batch on (sublane, lane)
    w1f_ref: (4, 4) SMEM — 0.5 * W1, layout (in, out)
    b1f_ref: (4,)  SMEM — 0.5 * b1
    w2f_ref: (4,)  SMEM — 0.25 * w2
    b2f_ref: (1,)  SMEM — 0.5 * b2 + 0.25 * sum(w2)
    o_ref  : (S, 128) VMEM f32 — lane-dense output
    """
    # Full-vreg (S, 128) feature slices.
    x0 = x_ref[0]
    x1 = x_ref[1]
    x2 = x_ref[2]
    x3 = x_ref[3]

    acc = None
    # Unrolled scalar-broadcast FMA chain on the VPU; tanh goes to the EUP slot.
    for j in range(4):
        # t_j = tanh(0.5 * (x @ W1[:, j] + b1[j]))   (0.5 folded into w1f/b1f)
        t = jnp.tanh(x0 * w1f_ref[0, j] + x1 * w1f_ref[1, j]
                     + x2 * w1f_ref[2, j] + x3 * w1f_ref[3, j] + b1f_ref[j])
        # sigmoid(z1)=0.5*t+0.5 and the 0.5 of the outer sigmoid argument are
        # folded into w2f/b2f, so layer 2 is a plain FMA chain on t.
        if j == 0:
            acc = t * w2f_ref[0]
        else:
            acc = acc + t * w2f_ref[j]

    o_ref[...] = 0.5 * jnp.tanh(acc + b2f_ref[0]) + 0.5


def network_forward(x, w1, b1, w2, b2, *, tile_rows=None):
    """x: (B, 4) f32; w1: (4, 4) (in,out); b1: (4,); w2: (4, 1); b2: (1,).

    Returns (B, 1) f32, matching the PyTorch module's forward.
    """
    B = x.shape[0]
    assert x.shape[1] == 4

    R = pl.cdiv(B, LANES)  # number of 128-sample lane rows
    if tile_rows is None:
        # Aim for >=8 grid steps on big batches (so v7x's two TensorCores both
        # get work), floor of 8 sublane rows (full (8,128) vregs), cap of 128
        # rows (~640 KiB double-buffered VMEM — tiny on every generation).
        tile_rows = min(128, max(8, 8 * pl.cdiv(pl.cdiv(R, 8), 8)))
    assert tile_rows % 8 == 0, "tile_rows must be a multiple of 8 sublanes"

    R_pad = pl.cdiv(R, tile_rows) * tile_rows
    B_pad = R_pad * LANES

    # Fold the sigmoid -> tanh rescalings into the 25 weight/bias scalars on
    # the host (scalar-only work, no extra HBM pass over tensor data).
    w1f = (0.5 * w1).astype(jnp.float32)                      # (4, 4) (in, out)
    b1f = (0.5 * b1).astype(jnp.float32)                      # (4,)
    w2v = w2.reshape(-1).astype(jnp.float32)                  # (4,)
    w2f = 0.25 * w2v                                          # (4,)
    b2f = (0.5 * b2.reshape(-1).astype(jnp.float32)
           + 0.25 * jnp.sum(w2v)).reshape(1)                  # (1,)

    # Single relayout pass: pad + transpose + split batch into (rows, 128).
    # TODO(synk): emit x feature-major upstream to remove this transpose pass.
    xt = jnp.pad(x.astype(jnp.float32), ((0, B_pad - B), (0, 0)))
    xt = xt.T.reshape(4, R_pad, LANES)

    grid = (R_pad // tile_rows,)
    out = pl.pallas_call(
        mlp_kernel,
        out_shape=jax.ShapeDtypeStruct((R_pad, LANES), jnp.float32),
        grid=grid,
        in_specs=[
            pl.BlockSpec((4, tile_rows, LANES), lambda i: (0, i, 0)),   # x tile
            pl.BlockSpec(memory_space=pltpu.MemorySpace.SMEM),          # w1f
            pl.BlockSpec(memory_space=pltpu.MemorySpace.SMEM),          # b1f
            pl.BlockSpec(memory_space=pltpu.MemorySpace.SMEM),          # w2f
            pl.BlockSpec(memory_space=pltpu.MemorySpace.SMEM),          # b2f
        ],
        out_specs=pl.BlockSpec((tile_rows, LANES), lambda i: (i, 0)),
        compiler_params=pltpu.CompilerParams(
            dimension_semantics=("parallel",)),
    )(xt, w1f, b1f, w2f, b2f)

    # Zero-copy reshape + contiguous prefix slice (padding tail discarded).
    return out.reshape(B_pad, 1)[:B]


def init_params(key):
    """Deterministic init mimicking nn.Linear default U(-1/sqrt(in), 1/sqrt(in))."""
    k1, k2, k3, k4 = jax.random.split(key, 4)
    bound = 1.0 / jnp.sqrt(4.0)
    # stored as (in, out) so the math is x @ W  (== PyTorch x @ weight.T)
    w1 = jax.random.uniform(k1, (4, 4), jnp.float32, -bound, bound)
    b1 = jax.random.uniform(k2, (4,), jnp.float32, -bound, bound)
    w2 = jax.random.uniform(k3, (4, 1), jnp.float32, -bound, bound)
    b2 = jax.random.uniform(k4, (1,), jnp.float32, -bound, bound)
    return w1, b1, w2, b2


def _reference(x, w1, b1, w2, b2):
    return jax.nn.sigmoid(jax.nn.sigmoid(x @ w1 + b1) @ w2 + b2)


if __name__ == "__main__":
    key = jax.random.PRNGKey(0)
    kx, kx2, kp = jax.random.split(key, 3)
    w1, b1, w2, b2 = init_params(kp)

    # Small batch (single grid step).
    B = 8
    x = jax.random.normal(kx, (B, 4), jnp.float32)
    out = jax.block_until_ready(network_forward(x, w1, b1, w2, b2))
    ref = _reference(x, w1, b1, w2, b2)
    assert out.shape == (B, 1)
    assert jnp.allclose(out, ref, atol=1e-5, rtol=1e-5)

    # Larger batch: exercises multiple grid steps and the padded tail.
    B2 = 2000
    x2 = jax.random.normal(kx2, (B2, 4), jnp.float32)
    out2 = jax.block_until_ready(network_forward(x2, w1, b1, w2, b2))
    ref2 = _reference(x2, w1, b1, w2, b2)
    assert out2.shape == (B2, 1)
    assert jnp.allclose(out2, ref2, atol=1e-5, rtol=1e-5)

    print("KERNEL_OK")
</pallas_src>

<mosaic_0001>
module attributes {stable_mosaic.version = 11 : i64} {
  func.func @mlp_kernel(%arg0: i32, %arg1: memref<4x8x128xf32, #tpu.memory_space<vmem>>, %arg2: memref<4x4xf32, #tpu.memory_space<smem>>, %arg3: memref<4xf32, #tpu.memory_space<smem>>, %arg4: memref<4xf32, #tpu.memory_space<smem>>, %arg5: memref<1xf32, #tpu.memory_space<smem>>, %arg6: memref<8x128xf32, #tpu.memory_space<vmem>>) attributes {dimension_semantics = [#tpu.dimension_semantics<parallel>], iteration_bounds = array<i64: 1>, scalar_prefetch = 0 : i64, scratch_operands = 0 : i64, tpu.core_type = #tpu.core_type<tc>, window_params = [{transform_indices = @transform_0, window_bounds = array<i64: 4, 8, 128>}, {transform_indices = @transform_1, window_bounds = array<i64: 4, 4>}, {transform_indices = @transform_2, window_bounds = array<i64: 4>}, {transform_indices = @transform_3, window_bounds = array<i64: 4>}, {transform_indices = @transform_4, window_bounds = array<i64: 1>}, {transform_indices = @transform_5, window_bounds = array<i64: 8, 128>}]} {
    %c0 = arith.constant 0 : index
    %c0_0 = arith.constant 0 : index
    %c0_1 = arith.constant 0 : index
    %0 = vector.load %arg1[%c0, %c0_0, %c0_1] : memref<4x8x128xf32, #tpu.memory_space<vmem>>, vector<1x8x128xf32>
    %1 = vector.shape_cast %0 : vector<1x8x128xf32> to vector<8x128xf32>
    %c1 = arith.constant 1 : index
    %c0_2 = arith.constant 0 : index
    %c0_3 = arith.constant 0 : index
    %2 = vector.load %arg1[%c1, %c0_2, %c0_3] : memref<4x8x128xf32, #tpu.memory_space<vmem>>, vector<1x8x128xf32>
    %3 = vector.shape_cast %2 : vector<1x8x128xf32> to vector<8x128xf32>
    %c2 = arith.constant 2 : index
    %c0_4 = arith.constant 0 : index
    %c0_5 = arith.constant 0 : index
    %4 = vector.load %arg1[%c2, %c0_4, %c0_5] : memref<4x8x128xf32, #tpu.memory_space<vmem>>, vector<1x8x128xf32>
    %5 = vector.shape_cast %4 : vector<1x8x128xf32> to vector<8x128xf32>
    %c3 = arith.constant 3 : index
    %c0_6 = arith.constant 0 : index
    %c0_7 = arith.constant 0 : index
    %6 = vector.load %arg1[%c3, %c0_6, %c0_7] : memref<4x8x128xf32, #tpu.memory_space<vmem>>, vector<1x8x128xf32>
    %7 = vector.shape_cast %6 : vector<1x8x128xf32> to vector<8x128xf32>
    %c0_8 = arith.constant 0 : index
    %c0_9 = arith.constant 0 : index
    %8 = memref.load %arg2[%c0_8, %c0_9] : memref<4x4xf32, #tpu.memory_space<smem>>
    %9 = vector.broadcast %8 : f32 to vector<8x128xf32>
    %10 = arith.mulf %1, %9 : vector<8x128xf32>
    %c1_10 = arith.constant 1 : index
    %c0_11 = arith.constant 0 : index
    %11 = memref.load %arg2[%c1_10, %c0_11] : memref<4x4xf32, #tpu.memory_space<smem>>
    %12 = vector.broadcast %11 : f32 to vector<8x128xf32>
    %13 = arith.mulf %3, %12 : vector<8x128xf32>
    %14 = arith.addf %10, %13 : vector<8x128xf32>
    %c2_12 = arith.constant 2 : index
    %c0_13 = arith.constant 0 : index
    %15 = memref.load %arg2[%c2_12, %c0_13] : memref<4x4xf32, #tpu.memory_space<smem>>
    %16 = vector.broadcast %15 : f32 to vector<8x128xf32>
    %17 = arith.mulf %5, %16 : vector<8x128xf32>
    %18 = arith.addf %14, %17 : vector<8x128xf32>
    %c3_14 = arith.constant 3 : index
    %c0_15 = arith.constant 0 : index
    %19 = memref.load %arg2[%c3_14, %c0_15] : memref<4x4xf32, #tpu.memory_space<smem>>
    %20 = vector.broadcast %19 : f32 to vector<8x128xf32>
    %21 = arith.mulf %7, %20 : vector<8x128xf32>
    %22 = arith.addf %18, %21 : vector<8x128xf32>
    %c0_16 = arith.constant 0 : index
    %23 = memref.load %arg3[%c0_16] : memref<4xf32, #tpu.memory_space<smem>>
    %24 = vector.broadcast %23 : f32 to vector<8x128xf32>
    %25 = arith.addf %22, %24 : vector<8x128xf32>
    %26 = math.tanh %25 : vector<8x128xf32>
    %c0_17 = arith.constant 0 : index
    %27 = memref.load %arg4[%c0_17] : memref<4xf32, #tpu.memory_space<smem>>
    %28 = vector.broadcast %27 : f32 to vector<8x128xf32>
    %29 = arith.mulf %26, %28 : vector<8x128xf32>
    %c0_18 = arith.constant 0 : index
    %c1_19 = arith.constant 1 : index
    %30 = memref.load %arg2[%c0_18, %c1_19] : memref<4x4xf32, #tpu.memory_space<smem>>
    %31 = vector.broadcast %30 : f32 to vector<8x128xf32>
    %32 = arith.mulf %1, %31 : vector<8x128xf32>
    %c1_20 = arith.constant 1 : index
    %c1_21 = arith.constant 1 : index
    %33 = memref.load %arg2[%c1_20, %c1_21] : memref<4x4xf32, #tpu.memory_space<smem>>
    %34 = vector.broadcast %33 : f32 to vector<8x128xf32>
    %35 = arith.mulf %3, %34 : vector<8x128xf32>
    %36 = arith.addf %32, %35 : vector<8x128xf32>
    %c2_22 = arith.constant 2 : index
    %c1_23 = arith.constant 1 : index
    %37 = memref.load %arg2[%c2_22, %c1_23] : memref<4x4xf32, #tpu.memory_space<smem>>
    %38 = vector.broadcast %37 : f32 to vector<8x128xf32>
    %39 = arith.mulf %5, %38 : vector<8x128xf32>
    %40 = arith.addf %36, %39 : vector<8x128xf32>
    %c3_24 = arith.constant 3 : index
    %c1_25 = arith.constant 1 : index
    %41 = memref.load %arg2[%c3_24, %c1_25] : memref<4x4xf32, #tpu.memory_space<smem>>
    %42 = vector.broadcast %41 : f32 to vector<8x128xf32>
    %43 = arith.mulf %7, %42 : vector<8x128xf32>
    %44 = arith.addf %40, %43 : vector<8x128xf32>
    %c1_26 = arith.constant 1 : index
    %45 = memref.load %arg3[%c1_26] : memref<4xf32, #tpu.memory_space<smem>>
    %46 = vector.broadcast %45 : f32 to vector<8x128xf32>
    %47 = arith.addf %44, %46 : vector<8x128xf32>
    %48 = math.tanh %47 : vector<8x128xf32>
    %c1_27 = arith.constant 1 : index
    %49 = memref.load %arg4[%c1_27] : memref<4xf32, #tpu.memory_space<smem>>
    %50 = vector.broadcast %49 : f32 to vector<8x128xf32>
    %51 = arith.mulf %48, %50 : vector<8x128xf32>
    %52 = arith.addf %29, %51 : vector<8x128xf32>
    %c0_28 = arith.constant 0 : index
    %c2_29 = arith.constant 2 : index
    %53 = memref.load %arg2[%c0_28, %c2_29] : memref<4x4xf32, #tpu.memory_space<smem>>
    %54 = vector.broadcast %53 : f32 to vector<8x128xf32>
    %55 = arith.mulf %1, %54 : vector<8x128xf32>
    %c1_30 = arith.constant 1 : index
    %c2_31 = arith.constant 2 : index
    %56 = memref.load %arg2[%c1_30, %c2_31] : memref<4x4xf32, #tpu.memory_space<smem>>
    %57 = vector.broadcast %56 : f32 to vector<8x128xf32>
    %58 = arith.mulf %3, %57 : vector<8x128xf32>
    %59 = arith.addf %55, %58 : vector<8x128xf32>
    %c2_32 = arith.constant 2 : index
    %c2_33 = arith.constant 2 : index
    %60 = memref.load %arg2[%c2_32, %c2_33] : memref<4x4xf32, #tpu.memory_space<smem>>
    %61 = vector.broadcast %60 : f32 to vector<8x128xf32>
    %62 = arith.mulf %5, %61 : vector<8x128xf32>
    %63 = arith.addf %59, %62 : vector<8x128xf32>
    %c3_34 = arith.constant 3 : index
    %c2_35 = arith.constant 2 : index
    %64 = memref.load %arg2[%c3_34, %c2_35] : memref<4x4xf32, #tpu.memory_space<smem>>
    %65 = vector.broadcast %64 : f32 to vector<8x128xf32>
    %66 = arith.mulf %7, %65 : vector<8x128xf32>
    %67 = arith.addf %63, %66 : vector<8x128xf32>
    %c2_36 = arith.constant 2 : index
    %68 = memref.load %arg3[%c2_36] : memref<4xf32, #tpu.memory_space<smem>>
    %69 = vector.broadcast %68 : f32 to vector<8x128xf32>
    %70 = arith.addf %67, %69 : vector<8x128xf32>
    %71 = math.tanh %70 : vector<8x128xf32>
    %c2_37 = arith.constant 2 : index
    %72 = memref.load %arg4[%c2_37] : memref<4xf32, #tpu.memory_space<smem>>
    %73 = vector.broadcast %72 : f32 to vector<8x128xf32>
    %74 = arith.mulf %71, %73 : vector<8x128xf32>
    %75 = arith.addf %52, %74 : vector<8x128xf32>
    %c0_38 = arith.constant 0 : index
    %c3_39 = arith.constant 3 : index
    %76 = memref.load %arg2[%c0_38, %c3_39] : memref<4x4xf32, #tpu.memory_space<smem>>
    %77 = vector.broadcast %76 : f32 to vector<8x128xf32>
    %78 = arith.mulf %1, %77 : vector<8x128xf32>
    %c1_40 = arith.constant 1 : index
    %c3_41 = arith.constant 3 : index
    %79 = memref.load %arg2[%c1_40, %c3_41] : memref<4x4xf32, #tpu.memory_space<smem>>
    %80 = vector.broadcast %79 : f32 to vector<8x128xf32>
    %81 = arith.mulf %3, %80 : vector<8x128xf32>
    %82 = arith.addf %78, %81 : vector<8x128xf32>
    %c2_42 = arith.constant 2 : index
    %c3_43 = arith.constant 3 : index
    %83 = memref.load %arg2[%c2_42, %c3_43] : memref<4x4xf32, #tpu.memory_space<smem>>
    %84 = vector.broadcast %83 : f32 to vector<8x128xf32>
    %85 = arith.mulf %5, %84 : vector<8x128xf32>
    %86 = arith.addf %82, %85 : vector<8x128xf32>
    %c3_44 = arith.constant 3 : index
    %c3_45 = arith.constant 3 : index
    %87 = memref.load %arg2[%c3_44, %c3_45] : memref<4x4xf32, #tpu.memory_space<smem>>
    %88 = vector.broadcast %87 : f32 to vector<8x128xf32>
    %89 = arith.mulf %7, %88 : vector<8x128xf32>
    %90 = arith.addf %86, %89 : vector<8x128xf32>
    %c3_46 = arith.constant 3 : index
    %91 = memref.load %arg3[%c3_46] : memref<4xf32, #tpu.memory_space<smem>>
    %92 = vector.broadcast %91 : f32 to vector<8x128xf32>
    %93 = arith.addf %90, %92 : vector<8x128xf32>
    %94 = math.tanh %93 : vector<8x128xf32>
    %c3_47 = arith.constant 3 : index
    %95 = memref.load %arg4[%c3_47] : memref<4xf32, #tpu.memory_space<smem>>
    %96 = vector.broadcast %95 : f32 to vector<8x128xf32>
    %97 = arith.mulf %94, %96 : vector<8x128xf32>
    %98 = arith.addf %75, %97 : vector<8x128xf32>
    %c0_48 = arith.constant 0 : index
    %99 = memref.load %arg5[%c0_48] : memref<1xf32, #tpu.memory_space<smem>>
    %100 = vector.broadcast %99 : f32 to vector<8x128xf32>
    %101 = arith.addf %98, %100 : vector<8x128xf32>
    %102 = math.tanh %101 : vector<8x128xf32>
    %cst = arith.constant 5.000000e-01 : f32
    %103 = vector.broadcast %cst : f32 to vector<8x128xf32>
    %104 = arith.mulf %103, %102 : vector<8x128xf32>
    %cst_49 = arith.constant 5.000000e-01 : f32
    %105 = vector.broadcast %cst_49 : f32 to vector<8x128xf32>
    %106 = arith.addf %104, %105 : vector<8x128xf32>
    %c0_50 = arith.constant 0 : index
    %c0_51 = arith.constant 0 : index
    %107 = vector.load %arg6[%c0_50, %c0_51] : memref<8x128xf32, #tpu.memory_space<vmem>>, vector<8x128xf32>
    tpu.vector_store %arg6[%c0_50, %c0_51], %106 {strides = array<i32>} : memref<8x128xf32, #tpu.memory_space<vmem>>, vector<8x128xf32>,
    return
  }
  func.func @transform_0(%arg0: i32) -> (i32, i32, i32) {
    %c0_i32 = arith.constant 0 : i32
    %c0_i32_0 = arith.constant 0 : i32
    %c0_i32_1 = arith.constant 0 : i32
    return %c0_i32, %arg0, %c0_i32_0 : i32, i32, i32
  }
  func.func @transform_1(%arg0: i32) -> (i32, i32) {
    %c0_i32 = arith.constant 0 : i32
    %c0_i32_0 = arith.constant 0 : i32
    %c0_i32_1 = arith.constant 0 : i32
    return %c0_i32, %c0_i32_0 : i32, i32
  }
  func.func @transform_2(%arg0: i32) -> i32 {
    %c0_i32 = arith.constant 0 : i32
    %c0_i32_0 = arith.constant 0 : i32
    return %c0_i32 : i32
  }
  func.func @transform_3(%arg0: i32) -> i32 {
    %c0_i32 = arith.constant 0 : i32
    %c0_i32_0 = arith.constant 0 : i32
    return %c0_i32 : i32
  }
  func.func @transform_4(%arg0: i32) -> i32 {
    %c0_i32 = arith.constant 0 : i32
    %c0_i32_0 = arith.constant 0 : i32
    return %c0_i32 : i32
  }
  func.func @transform_5(%arg0: i32) -> (i32, i32) {
    %c0_i32 = arith.constant 0 : i32
    %c0_i32_0 = arith.constant 0 : i32
    return %arg0, %c0_i32 : i32, i32
  }
}

</mosaic_0001>

<bundles_post_ra>
// kernel: tpu_custom_call.1
= control target key start
LH: loop header
LB: loop body
LE: loop exit
PB: predicated region body
PF: predicated region fallthrough
CT: control target
= control target key end

     0   :  { %11 = vsyncpa [#allocation4], 0  ;;  %s417_s0 = inlined_call_operand.hbm [shape: f32[4,8,128], index: 0, kind: input, shape index: {}]   ;;  %s418_s1 = inlined_call_operand.vmem [shape: f32[4,4], index: 1, kind: input, shape index: {}]   ;;  %s419_s2 = inlined_call_operand.vmem [shape: f32[4], index: 2, kind: input, shape index: {}]   ;;  %s420_s3 = inlined_call_operand.vmem [shape: f32[4], index: 3, kind: input, shape index: {}]   ;;  %s421_s4 = inlined_call_operand.<no memory space> [shape: f32[1], index: 4, kind: input, shape index: {}]   ;;  %s422_s5 = inlined_call_operand.hbm [shape: f32[8,128], index: 5, kind: output, shape index: {}]  }
   0x1   :  { %12 = vsyncpa [#allocation6], 0 }
   0x2   :  { %13 = vsyncpa [#allocation9], 0  ;;  %s43_s20 = sshll.u32 %s419_s2, 4  ;;  %s44_s20 = int_to_ptr.vmem [resolvable:$true] %s43_s20 }
   0x3   :  { %14 = vsyncpa [#allocation5], 0  ;;  %s232_s21 = scalar_lea.vmem %s44_s20, 16  ;;  %p237_p1 = scmp.lt.s32.totalorder %s44_s20, %s44_s20 }
   0x4   :  { %p233_p0 = scmp.ne.s32.totalorder %s44_s20, %s232_s21  ;;  %p238_p2 = scmp.lt.s32.totalorder %s232_s21, %s232_s21 }
   0x6   :  { %p239_p3 = por %p238_p2, %p237_p1 }
   0x8   :  { %p240_p4 = pnand %p239_p3, %p233_p0 }
   0xa   :  { %243 = shalt.err (!%p240_p4)
}
   0xb   :  { %s320_s22 = smov [#allocation8]   ;;  %s321_s23 = smov [#allocation3]  }
   0xc   :  { %46 = dma.vmem_to_smem %s44_s20, 16, %s320_s22, [#allocation9]  }
   0xd   :  { %s20_s24 = sshll.u32 %s321_s23, 4  ;;  %s244_s27 = scalar_lea.hbm %s417_s0, 512  ;;  %s21_s24 = int_to_ptr.vmem [resolvable:$true] %s20_s24 }
   0xe   :  { %p245_p5 = scmp.ne.s32.totalorder %s417_s0, %s244_s27  ;;  %p248_p6 = scmp.lt.u32.totalorder %s244_s27, %s417_s0 }
  0x10   :  { %p250_p7 = pnand %p248_p6, %p245_p5 }
  0x12   :  { %253 = shalt.err (!%p250_p7)
}
  0x13   :  { %s254_s6 = scalar_lea.vmem %s21_s24, 512  ;;  %p259_p9 = scmp.lt.s32.totalorder %s21_s24, %s21_s24 }
  0x14   :  { %p255_p8 = scmp.ne.s32.totalorder %s21_s24, %s254_s6  ;;  %p260_p10 = scmp.lt.s32.totalorder %s254_s6, %s254_s6 }
  0x16   :  { %p261_p11 = por %p260_p10, %p259_p9 }
  0x18   :  { %p262_p12 = pnand %p261_p11, %p255_p8 }
  0x1a   :  { %265 = shalt.err (!%p262_p12)
}
  0x1b   :  { %s322_s7 = smov 128   ;;  %s323_s8 = smov 8  }
  0x1c   :  { %26 = dma.hbm_to_vmem [thread:$0]  %s417_s0, 512, %s21_s24, [#allocation4], %s322_s7, %s322_s7, %s323_s8  }
  0x1d   :  { %s33_s13 = sshll.u32 %s418_s1, 4  ;;  %s53_s16 = sshll.u32 %s420_s3, 4  ;;  %s34_s13 = int_to_ptr.vmem [resolvable:$true] %s33_s13  ;;  %s54_s16 = int_to_ptr.vmem [resolvable:$true] %s53_s16 }
  0x1e   :  { %s266_s17 = scalar_lea.vmem %s34_s13, 64  ;;  %p271_p0 = scmp.lt.s32.totalorder %s34_s13, %s34_s13 }
  0x1f   :  { %p267_p13 = scmp.ne.s32.totalorder %s34_s13, %s266_s17  ;;  %p272_p1 = scmp.lt.s32.totalorder %s266_s17, %s266_s17 }
  0x21   :  { %p273_p2 = por %p272_p1, %p271_p0 }
  0x23   :  { %p274_p3 = pnand %p273_p2, %p267_p13 }
  0x25   :  { %277 = shalt.err (!%p274_p3)
}
  0x26   :  { %s324_s18 = smov [#allocation7]   ;;  %s278_s0 = scalar_lea.vmem %s54_s16, 16 }
  0x27   :  { %36 = dma.vmem_to_smem %s34_s13, 64, %s324_s18, [#allocation6]  }
  0x28   :  { %p279_p4 = scmp.ne.s32.totalorder %s54_s16, %s278_s0  ;;  %p283_p5 = scmp.lt.s32.totalorder %s54_s16, %s54_s16 }
  0x29   :  { %p284_p6 = scmp.lt.s32.totalorder %s278_s0, %s278_s0 }
  0x2b   :  { %p285_p7 = por %p284_p6, %p283_p5 }
  0x2d   :  { %p286_p8 = pnand %p285_p7, %p279_p4 }
  0x2f   :  { %289 = shalt.err (!%p286_p8)
}
  0x30   :  { %s325_s1 = smov [#allocation10]  }
  0x31   :  { %56 = dma.vmem_to_smem %s54_s16, 16, %s325_s1, [#allocation9]  }
  0x32   :  { %312 = dma.done.wait [#allocation4], 512  }
  0x33   :  { %313 = vsyncadd [#allocation4], 4294966784 }
  0x34   :  { %314 = dma.done.wait [#allocation6], 64  }
  0x35   :  { %315 = vsyncadd [#allocation6], 4294967232 }
  0x36   :  { %316 = dma.done.wait [#allocation9], 32  }
  0x37   :  { %317 = vsyncadd [#allocation9], 4294967264 }
  0x38   :  { %71 = sfence }
  0x39   :  { %s79_s3 = sld [smem:[#allocation7]]  ;;  %s197_s23 = sld [smem:[#allocation7 + $0x1]]  ;;  %v72_v0 = vld [vmem:[#allocation3] sm:$0xff]  ;;  %v74_v1 = vld [vmem:[#allocation3 + $0x8] sm:$0xff]  ;;  %v76_v2 = vld [vmem:[#allocation3 + $0x10] sm:$0xff] }
  0x3a   :  { %s194_s19 = sld [smem:[#allocation7 + $0x80]]  ;;  %s198_s24 = sld [smem:[#allocation7 + $0x81]]  ;;  %v78_v3 = vld [vmem:[#allocation3 + $0x18] sm:$0xff] }
  0x3b   :  { %s195_s20 = sld [smem:[#allocation7 + $0x100]]  ;;  %s199_s25 = sld [smem:[#allocation7 + $0x101]] }
  0x3c   :  { %s196_s21 = sld [smem:[#allocation7 + $0x180]]  ;;  %s380_s26 = sld [smem:[#allocation7 + $0x181]] }
  0x3d   :  { %s378_s22 = sld [smem:[#allocation8]]  ;;  %s382_s27 = sld [smem:[#allocation8 + $0x1]] }
  0x3e   :  { %s203_s28 = sld [smem:[#allocation7 + $0x2]]  ;;  %s386_s6 = sld [smem:[#allocation7 + $0x3]] }
  0x3f   :  { %v80_v4 = vstv %s79_s3  ;;  %s204_s2 = sld [smem:[#allocation7 + $0x82]]  ;;  %v102_v12 = vstv %s197_s23  ;;  %s210_s7 = sld [smem:[#allocation7 + $0x83]] }
  0x40   :  { %v81_v5 = vmul.f32 %v80_v4, %v72_v0  ;;  %v83_v6 = vstv %s194_s19  ;;  %s205_s29 = sld [smem:[#allocation7 + $0x102]]  ;;  %v103_v14 = vmul.f32 %v102_v12, %v72_v0  ;;  %v105_v15 = vstv %s198_s24  ;;  %s388_s8 = sld [smem:[#allocation7 + $0x103]] }
  0x41   :  { %v87_v7 = vstv %s195_s20  ;;  %v84_v8 = vmul.f32 %v83_v6, %v74_v1  ;;  %s384_s30 = sld [smem:[#allocation7 + $0x182]]  ;;  %v109_v16 = vstv %s199_s25  ;;  %v106_v17 = vmul.f32 %v105_v15, %v74_v1  ;;  %s393_s10 = sld [smem:[#allocation7 + $0x183]] }
  0x42   :  { %v88_v9 = vmul.f32 %v87_v7, %v76_v2  ;;  %v91_v10 = vstv %s196_s21  ;;  %v110_v18 = vmul.f32 %v109_v16, %v76_v2  ;;  %v113_v19 = vstv %s380_s26  ;;  %s391_s9 = sld [smem:[#allocation8 + $0x2]]  ;;  %s213_s11 = sld [smem:[#allocation8 + $0x3]] }
  0x43   :  { %v92_v11 = vmul.f32 %v91_v10, %v78_v3  ;;  %v85_v13 = vadd.f32 %v84_v8, %v81_v5  ;;  %v95_v21 = vstv %s378_s22  ;;  %v114_v22 = vmul.f32 %v113_v19, %v78_v3  ;;  %s98_s12 = sld [smem:[#allocation10]]  ;;  %s202_s13 = sld [smem:[#allocation10 + $0x1]] }
  0x44   :  { %v125_v23 = vstv %s203_s28  ;;  %v107_v24 = vadd.f32 %v106_v17, %v103_v14  ;;  %v117_v33 = vstv %s382_s27  ;;  %v148_v37 = vstv %s386_s6  ;;  %s208_s14 = sld [smem:[#allocation10 + $0x2]]  ;;  %s214_s15 = sld [smem:[#allocation10 + $0x3]] }
  0x45   :  { %v89_v20 = vadd.f32 %v88_v9, %v85_v13  ;;  %v126_v25 = vmul.f32 %v125_v23, %v72_v0  ;;  %v128_v26 = vstv %s204_s2  ;;  %v151_v38 = vstv %s210_s7  ;;  %s326_s18 = smov [#allocation11]  }
  0x46   :  { %v132_v27 = vstv %s205_s29  ;;  %v129_v29 = vmul.f32 %v128_v26, %v74_v1  ;;  %v111_v32 = vadd.f32 %v110_v18, %v107_v24  ;;  %v149_v40 = vmul.f32 %v148_v37, %v72_v0  ;;  %s183_s0 = sshll.u32 %s326_s18, 4  ;;  %s184_s0 = int_to_ptr.vmem [resolvable:$true] %s183_s0 }
  0x47   :  { %v93_v28 = vadd.f32 %v92_v11, %v89_v20  ;;  %v133_v30 = vmul.f32 %v132_v27, %v76_v2  ;;  %v136_v31 = vstv %s384_s30  ;;  %v152_v41 = vmul.f32 %v151_v38, %v74_v1  ;;  %s290_s1 = scalar_lea.vmem %s184_s0, 128  ;;  %p295_p10 = scmp.lt.s32.totalorder %s184_s0, %s184_s0 }
  0x48   :  { %v137_v34 = vmul.f32 %v136_v31, %v78_v3  ;;  %v130_v36 = vadd.f32 %v129_v29, %v126_v25  ;;  %v115_v39 = vadd.f32 %v114_v22, %v111_v32  ;;  %v155_v42 = vstv %s388_s8  ;;  %p291_p9 = scmp.ne.s32.totalorder %s184_s0, %s290_s1  ;;  %p296_p11 = scmp.lt.s32.totalorder %s290_s1, %s290_s1 }
  0x49   :  { %v96_v35 = vadd.f32 %v95_v21, %v93_v28  ;;  %v156_v44 = vmul.f32 %v155_v42, %v76_v2  ;;  %v159_v45 = vstv %s393_s10  ;;  %v140_v47 = vstv %s391_s9 }
  0x4a   :  { %v134_v43 = vadd.f32 %v133_v30, %v130_v36  ;;  %v118_v46 = vadd.f32 %v117_v33, %v115_v39  ;;  %v153_v48 = vadd.f32 %v152_v41, %v149_v40  ;;  %v160_v49 = vmul.f32 %v159_v45, %v78_v3  ;;  %p297_p12 = por %p296_p11, %p295_p10 }
  0x4b   :  { %222 = vtanh.f32 %v96_v35  ;;  %v163_v53 = vstv %s213_s11  ;;  %v99_v56 = vstv %s98_s12  ;;  %v121_v58 = vstv %s202_s13 }
  0x4c   :  { %v138_v50 = vadd.f32 %v137_v34, %v134_v43  ;;  %224 = vtanh.f32 %v118_v46  ;;  %v157_v51 = vadd.f32 %v156_v44, %v153_v48  ;;  %v144_v62 = vstv %s208_s14  ;;  %p298_p13 = pnand %p297_p12, %p291_p9 }
  0x4d   :  { %v167_v2 = vstv %s214_s15  ;;  %v171_v6 = vstv %s421_s4 }
  0x4e   :  { %v141_v52 = vadd.f32 %v140_v47, %v138_v50  ;;  %v161_v54 = vadd.f32 %v160_v49, %v157_v51 }
  0x50   :  { %226 = vtanh.f32 %v141_v52  ;;  %v164_v55 = vadd.f32 %v163_v53, %v161_v54 }
  0x52   :  { %228 = vtanh.f32 %v164_v55 }
  0x55   :  { %v223_v57 = vpop.eup %222 }
  0x56   :  { %v100_v59 = vmul.f32 %v223_v57, %v99_v56  ;;  %v225_v60 = vpop.eup %224 }
  0x57   :  { %v122_v61 = vmul.f32 %v225_v60, %v121_v58 }
  0x59   :  { %v123_v0 = vadd.f32 %v122_v61, %v100_v59 }
  0x5a   :  { %v227_v63 = vpop.eup %226 }
  0x5b   :  { %v145_v1 = vmul.f32 %v227_v63, %v144_v62 }
  0x5c   :  { %v229_v3 = vpop.eup %228 }
  0x5d   :  { %v146_v4 = vadd.f32 %v145_v1, %v123_v0  ;;  %v168_v5 = vmul.f32 %v229_v3, %v167_v2 }
  0x5f   :  { %v169_v7 = vadd.f32 %v168_v5, %v146_v4 }
  0x61   :  { %v172_v8 = vadd.f32 %v171_v6, %v169_v7 }
  0x63   :  { %230 = vtanh.f32 %v172_v8 }
  0x6d   :  { %v231_v9 = vpop.eup %230 }
  0x6e   :  { %v174_v10 = vmul.f32 0.5, %v231_v9 }
  0x70   :  { %v175_v11 = vadd.f32 0.5, %v174_v10 }
  0x72   :  { %176 = vst [vmem:[#allocation11] sm:$0xff] %v175_v11 }
  0x73   :  { %301 = shalt.err (!%p298_p13)
}
  0x74   :  { %s302_s4 = scalar_lea.hbm %s422_s5, 128 }
  0x75   :  { %p303_p0 = scmp.ne.s32.totalorder %s422_s5, %s302_s4  ;;  %p306_p1 = scmp.lt.u32.totalorder %s302_s4, %s422_s5 }
  0x77   :  { %p308_p2 = pnand %p306_p1, %p303_p0 }
  0x79   :  { %311 = shalt.err (!%p308_p2)
}
  0x7a   :  { %186 = dma.vmem_to_hbm [thread:$0]  %s184_s0, 128, %s422_s5, [#allocation5]  }
  0x7b   :  { %318 = dma.done.wait [#allocation5], 128  }
  0x7c   :  { %319 = vsyncadd [#allocation5], 4294967168 }
  0x7d   :  { %190 = vsyncpa [#allocation4], 1 }
  0x7e   :  { %191 = vsyncpa [#allocation5], 1 }
  0x7f   :  { %192 = vsyncpa [#allocation6], 1 }
  0x80   :  { %193 = vsyncpa [#allocation9], 1 }

</bundles_post_ra>
